<compile_context>
chip_gen: v7x
topology: tpu7x:2x2x1
jax: 0.10.0
libtpu: 0.0.40
codegen_flags: <defaults>
</compile_context>

<pallas_src>
import jax
import jax.numpy as jnp
from jax.experimental import pallas as pl
from jax.experimental.pallas import tpu as pltpu


_LANES = 128
_SMALL_INPUT_BYTES = 256 * 1024      # below this, a Pallas launch can't be amortized
_MIN_SPLIT_BYTES = 1 * 1024 * 1024   # above this, force >=2 grid steps (2-TC sharding)


def _scale_bias_kernel(w_ref, b_ref, x_ref, o_ref):
    # w_ref / b_ref: shape-(1,) float32 scalars in SMEM.
    # Compute in f32 and cast back: matches PyTorch's f32-Parameter promotion
    # numerics for low-precision inputs; free since the kernel is HBM-bound.
    x = x_ref[...].astype(jnp.float32)
    o_ref[...] = (x * w_ref[0] + b_ref[0]).astype(o_ref.dtype)


def _jnp_scale_bias(x, w, b):
    # TODO(synk): integer input dtypes would truncate here; float inputs only.
    return (x.astype(jnp.float32) * w[0] + b[0]).astype(x.dtype)


def _target_block_bytes():
    """Per-generation HBM streaming block size."""
    try:
        kind = jax.devices()[0].device_kind.lower()
    except Exception:  # pragma: no cover - e.g. during AOT tracing without devices
        kind = ""
    if "v7" in kind:
        # v7x: 2x256 MXU-era HBM (~3.2 TB/s/TC) -> bigger blocks so the fixed
        # ~0.35us per-grid-step cost stays <10% of each step.
        return 8 * 1024 * 1024
    # v5e / v6e measured sweet spot; beyond 4 MiB is diminishing returns.
    return 4 * 1024 * 1024


def _scale_bias_2d(x2d, w, b):
    """Run the Pallas kernel over a lane-dense (rows, 128) slab."""
    rows, lanes = x2d.shape
    dtype = x2d.dtype
    itemsize = jnp.dtype(dtype).itemsize

    block_bytes = _target_block_bytes()
    # Sublane multiple: 8 rows for 32-bit, 16 for 16-bit, 32 for 8-bit dtypes.
    sub_mult = max(8, 32 // itemsize)
    max_tile_rows = max(
        sub_mult, (block_bytes // (lanes * itemsize)) // sub_mult * sub_mult
    )

    slab_bytes = rows * lanes * itemsize
    if slab_bytes <= _MIN_SPLIT_BYTES or rows <= 2 * sub_mult:
        # Small slab: one block spanning the full array dims (always legal).
        tile_rows = rows
    else:
        # At least two blocks so ("parallel",) shards across v7x's 2 TensorCores
        # and the pipeline overlaps DMA-in / compute / DMA-out.
        half = pl.cdiv(pl.cdiv(rows, 2), sub_mult) * sub_mult
        tile_rows = min(max_tile_rows, half)

    grid = (pl.cdiv(rows, tile_rows),)  # Pallas masks the partial last block

    tile_bytes = tile_rows * lanes * itemsize
    # in + out, double-buffered, plus headroom; capped under v7x's 64 MiB VMEM.
    vmem_limit = int(min(max(4 * tile_bytes + (4 << 20), 16 << 20), 40 << 20))

    return pl.pallas_call(
        _scale_bias_kernel,
        out_shape=jax.ShapeDtypeStruct((rows, lanes), dtype),
        grid=grid,
        in_specs=[
            pl.BlockSpec(memory_space=pltpu.MemorySpace.SMEM),   # weight scalar (f32)
            pl.BlockSpec(memory_space=pltpu.MemorySpace.SMEM),   # bias scalar (f32)
            pl.BlockSpec((tile_rows, lanes), lambda i: (i, 0)),  # x tile
        ],
        out_specs=pl.BlockSpec((tile_rows, lanes), lambda i: (i, 0)),
        compiler_params=pltpu.CompilerParams(
            dimension_semantics=("parallel",),  # shards the 1-D grid across 2 TCs
            vmem_limit_bytes=vmem_limit,
        ),
    )(w, b, x2d)


def scalar_scale_bias(x, weight, bias, *, min_pallas_bytes=_SMALL_INPUT_BYTES):
    """Apply y = x * weight + bias elementwise (Pallas TPU kernel on the hot path).

    x:      any-shape array (e.g. NCHW activations).
    weight: scalar / shape-(1,) scale parameter.
    bias:   scalar / shape-(1,) bias parameter.
    min_pallas_bytes: inputs smaller than this go through plain jnp (the Pallas
        launch cost can never be amortized and it blocks XLA fusion).
    """
    orig_shape = x.shape
    dtype = x.dtype
    n = x.size
    if n == 0:
        return x

    w = jnp.asarray(weight, jnp.float32).reshape(1)
    b = jnp.asarray(bias, jnp.float32).reshape(1)
    itemsize = jnp.dtype(dtype).itemsize

    # Tiny-input fast path: skip the custom-call entirely.
    if n * itemsize < min_pallas_bytes or n < _LANES:
        return _jnp_scale_bias(x, w, b)

    if n % _LANES == 0:
        # Common case: free metadata reshape to a lane-dense slab.
        out2d = _scale_bias_2d(x.reshape(n // _LANES, _LANES), w, b)
        return out2d.reshape(orig_shape)

    # Rare non-128-divisible size: Pallas on the lane-aligned prefix, plain jnp
    # on the <128-element tail. No jnp.pad + slice round-trip (which would cost
    # ~2 extra HBM passes).
    x_flat = jnp.ravel(x)
    split = (n // _LANES) * _LANES
    head = _scale_bias_2d(x_flat[:split].reshape(split // _LANES, _LANES), w, b)
    tail = _jnp_scale_bias(x_flat[split:], w, b)
    return jnp.concatenate([head.reshape(-1), tail]).reshape(orig_shape)


class ScalarScaleBias:
    """JAX/Pallas mirror of the PyTorch ScalarScaleBias module."""

    def __init__(self, scale=True, scale_init=1.0, bias=True, bias_init=0.0,
                 dtype=jnp.float32):
        # Deterministic init exactly as reset_parameters() does (constant fill).
        self.weight = jnp.full((1,), scale_init, dtype=dtype) if scale else None
        self.bias = jnp.full((1,), bias_init, dtype=dtype) if bias else None

    def __call__(self, x):
        # Fold disabled params into identity constants so the hot path is always
        # a single fused kernel; values match the PyTorch forward branches.
        w = self.weight if self.weight is not None else jnp.ones((1,), jnp.float32)
        b = self.bias if self.bias is not None else jnp.zeros((1,), jnp.float32)
        return scalar_scale_bias(x, w, b)


if __name__ == "__main__":
    key = jax.random.PRNGKey(0)
    k1, k2, k3, k4 = jax.random.split(key, 4)

    # Small NCHW input, like the PyTorch module would see (module path; this
    # size takes the small-input jnp fast path by design).
    x = jax.random.normal(k1, (2, 4, 16, 16), dtype=jnp.float32)
    mod = ScalarScaleBias(scale=True, scale_init=1.5, bias=True, bias_init=-0.25)
    y = jax.block_until_ready(mod(x))
    assert y.shape == x.shape and y.dtype == x.dtype
    assert jnp.allclose(y, x * 1.5 - 0.25, atol=1e-6, rtol=1e-6)

    # Same small input forced through the Pallas kernel (single full-extent block).
    y_p = jax.block_until_ready(
        scalar_scale_bias(x, jnp.array([1.5], jnp.float32),
                          jnp.array([-0.25], jnp.float32), min_pallas_bytes=0))
    assert jnp.allclose(y_p, x * 1.5 - 0.25, atol=1e-6, rtol=1e-6)

    # Multi-block grid with a masked partial last block (Pallas path).
    x_big = jax.random.normal(k2, (4104, 512), dtype=jnp.float32)
    y_big = jax.block_until_ready(
        scalar_scale_bias(x_big, jnp.array([0.5], jnp.float32),
                          jnp.array([1.25], jnp.float32)))
    assert jnp.allclose(y_big, x_big * 0.5 + 1.25, atol=1e-5, rtol=1e-5)

    # Non-128-divisible size above the fast-path threshold: Pallas prefix + jnp tail.
    x_odd = jax.random.normal(k3, (517, 1031), dtype=jnp.float32)   # 533,027 elems
    y_odd = jax.block_until_ready(
        scalar_scale_bias(x_odd, jnp.array([2.0], jnp.float32),
                          jnp.array([0.5], jnp.float32)))
    assert y_odd.shape == x_odd.shape
    assert jnp.allclose(y_odd, x_odd * 2.0 + 0.5, atol=1e-5, rtol=1e-5)

    # bf16 input: internal f32 compute, output cast back to bf16 (Pallas path).
    x_bf = jax.random.normal(k4, (256, 512), dtype=jnp.bfloat16)
    y_bf = jax.block_until_ready(
        scalar_scale_bias(x_bf, jnp.array([2.0], jnp.float32),
                          jnp.array([0.5], jnp.float32)))
    ref_bf = (x_bf.astype(jnp.float32) * 2.0 + 0.5).astype(jnp.bfloat16)
    assert y_bf.dtype == jnp.bfloat16
    assert jnp.allclose(y_bf.astype(jnp.float32), ref_bf.astype(jnp.float32),
                        atol=1e-2, rtol=1e-2)

    # Scale-only and bias-only module branches.
    y_s = jax.block_until_ready(ScalarScaleBias(scale=True, scale_init=3.0, bias=False)(x))
    assert jnp.allclose(y_s, x * 3.0, atol=1e-6, rtol=1e-6)
    y_b = jax.block_until_ready(ScalarScaleBias(scale=False, bias=True, bias_init=0.75)(x))
    assert jnp.allclose(y_b, x + 0.75, atol=1e-6, rtol=1e-6)

    print("KERNEL_OK")
</pallas_src>

<mosaic_0001>
module attributes {stable_mosaic.version = 11 : i64} {
  func.func @_scale_bias_kernel(%arg0: i32, %arg1: memref<1xf32, #tpu.memory_space<smem>>, %arg2: memref<1xf32, #tpu.memory_space<smem>>, %arg3: memref<16x128xf32, #tpu.memory_space<vmem>>, %arg4: memref<16x128xf32, #tpu.memory_space<vmem>>) attributes {dimension_semantics = [#tpu.dimension_semantics<parallel>], iteration_bounds = array<i64: 1>, scalar_prefetch = 0 : i64, scratch_operands = 0 : i64, tpu.core_type = #tpu.core_type<tc>, window_params = [{transform_indices = @transform_0, window_bounds = array<i64: 1>}, {transform_indices = @transform_1, window_bounds = array<i64: 1>}, {transform_indices = @transform_2, window_bounds = array<i64: 16, 128>}, {transform_indices = @transform_3, window_bounds = array<i64: 16, 128>}]} {
    %c0 = arith.constant 0 : index
    %c0_0 = arith.constant 0 : index
    %0 = vector.load %arg3[%c0, %c0_0] : memref<16x128xf32, #tpu.memory_space<vmem>>, vector<16x128xf32>
    %c0_1 = arith.constant 0 : index
    %1 = memref.load %arg1[%c0_1] : memref<1xf32, #tpu.memory_space<smem>>
    %2 = vector.broadcast %1 : f32 to vector<16x128xf32>
    %3 = arith.mulf %0, %2 : vector<16x128xf32>
    %c0_2 = arith.constant 0 : index
    %4 = memref.load %arg2[%c0_2] : memref<1xf32, #tpu.memory_space<smem>>
    %5 = vector.broadcast %4 : f32 to vector<16x128xf32>
    %6 = arith.addf %3, %5 : vector<16x128xf32>
    %c0_3 = arith.constant 0 : index
    %c0_4 = arith.constant 0 : index
    %7 = vector.load %arg4[%c0_3, %c0_4] : memref<16x128xf32, #tpu.memory_space<vmem>>, vector<16x128xf32>
    tpu.vector_store %arg4[%c0_3, %c0_4], %6 {strides = array<i32>} : memref<16x128xf32, #tpu.memory_space<vmem>>, vector<16x128xf32>,
    return
  }
  func.func @transform_0(%arg0: i32) -> i32 {
    %c0_i32 = arith.constant 0 : i32
    %c0_i32_0 = arith.constant 0 : i32
    return %c0_i32 : i32
  }
  func.func @transform_1(%arg0: i32) -> i32 {
    %c0_i32 = arith.constant 0 : i32
    %c0_i32_0 = arith.constant 0 : i32
    return %c0_i32 : i32
  }
  func.func @transform_2(%arg0: i32) -> (i32, i32) {
    %c0_i32 = arith.constant 0 : i32
    %c0_i32_0 = arith.constant 0 : i32
    return %arg0, %c0_i32 : i32, i32
  }
  func.func @transform_3(%arg0: i32) -> (i32, i32) {
    %c0_i32 = arith.constant 0 : i32
    %c0_i32_0 = arith.constant 0 : i32
    return %arg0, %c0_i32 : i32, i32
  }
}

</mosaic_0001>

<bundles_post_ra>
// kernel: tpu_custom_call.1
= control target key start
LH: loop header
LB: loop body
LE: loop exit
PB: predicated region body
PF: predicated region fallthrough
CT: control target
= control target key end

     0   :  { %10 = vsyncpa [#allocation5], 0  ;;  %s172_s0 = inlined_call_operand.<no memory space> [shape: f32[1], index: 0, kind: input, shape index: {}]   ;;  %s173_s1 = inlined_call_operand.<no memory space> [shape: f32[1], index: 1, kind: input, shape index: {}]   ;;  %s174_s2 = inlined_call_operand.hbm [shape: f32[16,128], index: 2, kind: input, shape index: {}]   ;;  %s175_s3 = inlined_call_operand.hbm [shape: f32[16,128], index: 3, kind: output, shape index: {}]  }
   0x1   :  { %11 = vsyncpa [#allocation6], 0  ;;  %s112_s12 = smov [#allocation4]   ;;  %s64_s16 = scalar_lea.hbm %s174_s2, 256 }
   0x2   :  { %s21_s13 = sshll.u32 %s112_s12, 4  ;;  %p65_p0 = scmp.ne.s32.totalorder %s174_s2, %s64_s16  ;;  %s22_s13 = int_to_ptr.vmem [resolvable:$true] %s21_s13 }
   0x3   :  { %p68_p1 = scmp.lt.u32.totalorder %s64_s16, %s174_s2 }
   0x5   :  { %p70_p2 = pnand %p68_p1, %p65_p0 }
   0x7   :  { %73 = shalt.err (!%p70_p2)
}
   0x8   :  { %s74_s21 = scalar_lea.vmem %s22_s13, 256  ;;  %p79_p4 = scmp.lt.s32.totalorder %s22_s13, %s22_s13 }
   0x9   :  { %p75_p3 = scmp.ne.s32.totalorder %s22_s13, %s74_s21  ;;  %p80_p5 = scmp.lt.s32.totalorder %s74_s21, %s74_s21 }
   0xb   :  { %p81_p6 = por %p80_p5, %p79_p4 }
   0xd   :  { %p82_p7 = pnand %p81_p6, %p75_p3 }
   0xf   :  { %85 = shalt.err (!%p82_p7)
}
  0x10   :  { %s113_s22 = smov 128   ;;  %s114_s23 = smov 8  }
  0x11   :  { %27 = dma.hbm_to_vmem [thread:$0]  %s174_s2, 256, %s22_s13, [#allocation5], %s113_s22, %s113_s22, %s114_s23  }
  0x12   :  { %108 = dma.done.wait [#allocation5], 256  }
  0x13   :  { %109 = vsyncadd [#allocation5], 4294967040  ;;  %v34_v0 = vstv %s172_s0  ;;  %v31_v1 = vld [vmem:[#allocation4] sm:$0xff]  ;;  %v38_v2 = vstv %s173_s1  ;;  %v32_v3 = vld [vmem:[#allocation4 + $0x8] sm:$0xff]  ;;  %s115_s30 = smov [#allocation7]  }
  0x14   :  { %s48_s4 = sshll.u32 %s115_s30, 4  ;;  %v35_v4 = vmul.f32 %v34_v0, %v31_v1  ;;  %v36_v5 = vmul.f32 %v34_v0, %v32_v3  ;;  %s49_s4 = int_to_ptr.vmem [resolvable:$true] %s48_s4 }
  0x15   :  { %s86_s2 = scalar_lea.vmem %s49_s4, 256  ;;  %p91_p9 = scmp.lt.s32.totalorder %s49_s4, %s49_s4 }
  0x16   :  { %v39_v6 = vadd.f32 %v38_v2, %v35_v4  ;;  %v40_v7 = vadd.f32 %v38_v2, %v36_v5  ;;  %p87_p8 = scmp.ne.s32.totalorder %s49_s4, %s86_s2  ;;  %p92_p10 = scmp.lt.s32.totalorder %s86_s2, %s86_s2 }
  0x18   :  { %41 = vst [vmem:[#allocation7] sm:$0xff] %v39_v6  ;;  %42 = vst [vmem:[#allocation7 + $0x8] sm:$0xff] %v40_v7  ;;  %p93_p11 = por %p92_p10, %p91_p9 }
  0x1a   :  { %p94_p12 = pnand %p93_p11, %p87_p8 }
  0x1c   :  { %97 = shalt.err (!%p94_p12)
}
  0x1d   :  { %s98_s1 = scalar_lea.hbm %s175_s3, 256 }
  0x1e   :  { %p99_p13 = scmp.ne.s32.totalorder %s175_s3, %s98_s1  ;;  %p102_p0 = scmp.lt.u32.totalorder %s98_s1, %s175_s3 }
  0x20   :  { %p104_p1 = pnand %p102_p0, %p99_p13 }
  0x22   :  { %107 = shalt.err (!%p104_p1)
}
  0x23   :  { %54 = dma.vmem_to_hbm [thread:$0]  %s49_s4, 256, %s175_s3, [#allocation6], %s113_s22, %s113_s22, %s114_s23  }
  0x24   :  { %110 = dma.done.wait [#allocation6], 256  }
  0x25   :  { %111 = vsyncadd [#allocation6], 4294967040 }
  0x26   :  { %58 = vsyncpa [#allocation5], 1 }
  0x27   :  { %59 = vsyncpa [#allocation6], 1 }

</bundles_post_ra>
